<compile_context>
chip_gen: v5e
topology: v5e:2x2
jax: 0.10.0
libtpu: 0.0.40
codegen_flags: <defaults>
</compile_context>

<pallas_src>
import functools

import jax
import jax.numpy as jnp
import numpy as np
from jax.experimental import pallas as pl

MIN_VAL = -1.0
MAX_VAL = 1.0
SELF_ASSOC_WEIGHT = 1.0
_LANE = 128


def _ica_kernel(w_ref, x_ref, y_ref, wc_ref, *, fuse_scramble: bool):
    """Single-invocation ICA forward.

    w_ref : (M, M)     association matrix (unconstrained).
    x_ref : (B*M, A)   input, batch-major flattened (row b*M + m == x[b, m]).
    y_ref : (B*M, A)   output. If fuse_scramble, the module's
                       reshape((M,B,A)) + transpose(0,1) is already applied
                       (row i*M + k == y[i, k]); otherwise it holds the plain
                       per-batch matmul y0 (row b*M + m == (W @ x[b])[m]) and
                       the wrapper finishes the scramble with one XLA op.
    wc_ref: (M, M)     constrained W (aliased onto the W input, mirroring the
                       in-place constrain_() of the PyTorch module).
    """
    m = w_ref.shape[0]
    bm, a = x_ref.shape
    b = bm // m  # static batch size

    # ---- constrain_(): clamp to [min_val, max_val], diagonal = self weight.
    # Runs exactly once (single grid step); result written to the aliased output.
    w = jnp.clip(w_ref[...], MIN_VAL, MAX_VAL)
    row = jax.lax.broadcasted_iota(jnp.int32, (m, m), 0)
    col = jax.lax.broadcasted_iota(jnp.int32, (m, m), 1)
    w = jnp.where(row == col, jnp.full_like(w, SELF_ASSOC_WEIGHT), w)
    wc_ref[...] = w.astype(wc_ref.dtype)

    x = x_ref[...]  # (B*M, A)

    if b == 1:
        # Unbatched: the reshape/transpose in the original forward is a no-op.
        y_ref[...] = jnp.dot(w, x, preferred_element_type=jnp.float32).astype(y_ref.dtype)
        return

    # ---- fold batch into lanes: x_fold[:, r*A:(r+1)*A] = x[r].
    # Lane-concat of full-128-lane blocks -> ONE (M,M)@(M,B*A) MXU pass.
    # TODO(synk): for B beyond ~8, move the batch onto a grid axis instead of
    # unrolling this concat and the B*B block stores below.
    x_fold = jnp.concatenate([x[r * m:(r + 1) * m, :] for r in range(b)], axis=1)

    if not fuse_scramble:
        # General path (M % B != 0): emit y0 in its natural flat layout with
        # contiguous lane-block slices; the wrapper applies the module's
        # reshape/transpose scramble with a single XLA op.
        z = jnp.dot(w, x_fold, preferred_element_type=jnp.float32)  # (M, B*A)
        for r in range(b):
            y_ref[r * m:(r + 1) * m, :] = z[:, r * a:(r + 1) * a].astype(y_ref.dtype)
        return

    # ---- fused scramble (M % B == 0) -- no scratch, no second pass over y.
    # Output row i*M + r*(M/B) + t is  W_c[t*B + i, :] @ x[r],  so instead of
    # permuting the (B*M, A) result we permute the rows of the 1 KB W:
    #     W_perm[i*(M/B) + t, :] = W_c[t*B + i, :]
    # (B strided pl.ds reads of the constrained-W ref, concatenated), then
    #     Z = W_perm @ x_fold                         # still one MXU pass
    # and Z[i*(M/B):(i+1)*(M/B), r*A:(r+1)*A] is exactly the output block at
    # rows [i*M + r*(M/B), i*M + (r+1)*(M/B)) -> contiguous, lane-dense stores.
    mb = m // b
    w_perm = jnp.concatenate(
        [wc_ref[pl.ds(i, mb, stride=b), :] for i in range(b)], axis=0)   # (M, M)
    z = jnp.dot(w_perm, x_fold, preferred_element_type=jnp.float32)      # (M, B*A)
    for i in range(b):
        for r in range(b):
            y_ref[i * m + r * mb:i * m + (r + 1) * mb, :] = (
                z[i * mb:(i + 1) * mb, r * a:(r + 1) * a].astype(y_ref.dtype))


def ica_forward(w_assoc: jax.Array, x: jax.Array, *, return_constrained_w: bool = False):
    """Forward of the ICA layer. x: (B, M, A) or (M, A).

    If return_constrained_w, also returns the clamped/diag-set W (the PyTorch
    forward mutates the parameter in place via constrain_(); here it is an
    output aliased onto the parameter buffer).
    """
    is_batched = x.ndim == 3
    if not is_batched:
        x = x[None, ...]
    assert x.ndim == 3 and x.shape[1] == w_assoc.shape[0] == w_assoc.shape[1], (
        f"ICA: expected x of shape (B, {w_assoc.shape[0]}, A) or "
        f"({w_assoc.shape[0]}, A), got {x.shape}")
    batch, map_units, num_attrs = x.shape

    # Lane alignment: pad the attribute axis to a multiple of 128 so the
    # in-kernel lane-concat / lane-block slices stay full-vreg and stores stay
    # unmasked. The scramble only permutes whole rows, so column padding is
    # semantics-preserving; padded columns are sliced off below.
    # NOTE: map_units should ideally be a multiple of 8 (16 for bf16) so the
    # row-block slices are sublane-aligned; other values are still correct.
    a_pad = ((num_attrs + _LANE - 1) // _LANE) * _LANE
    if a_pad != num_attrs:
        x = jnp.pad(x, ((0, 0), (0, 0), (0, a_pad - num_attrs)))

    # In-kernel scramble requires M % B == 0; otherwise the kernel emits y0 and
    # the wrapper finishes the (cheap, M*B-row) permutation with XLA.
    fuse = (batch == 1) or (map_units % batch == 0)

    # Free leading-dim reshape (no data movement): the kernel works on the
    # batch-major flattened (B*M, A) layout so all loads/stores are 2-D,
    # contiguous and lane-dense.
    x2 = jnp.reshape(x, (batch * map_units, a_pad))

    # Whole problem is VMEM-resident (W 1 KB, x/y ~16 KB each at test shapes)
    # -> single gridless invocation, no per-step pipeline overhead, no scratch.
    # TODO(synk): at production sizes, tile the attribute (lane) axis with a
    # grid + BlockSpecs (W resident via a constant index_map), mark independent
    # axes "parallel" for v7x's two TensorCores, and set vmem_limit_bytes so
    # double-buffered blocks stay under v7x's 64 MiB (32 MiB scoped) VMEM.
    y2, w_c = pl.pallas_call(
        functools.partial(_ica_kernel, fuse_scramble=fuse),
        out_shape=(
            jax.ShapeDtypeStruct((batch * map_units, a_pad), x.dtype),
            jax.ShapeDtypeStruct(w_assoc.shape, w_assoc.dtype),
        ),
        # Constrained W overwrites the parameter buffer, like torch's constrain_().
        input_output_aliases={0: 1},
    )(w_assoc, x2)

    if fuse:
        y = jnp.reshape(y2, (batch, map_units, a_pad))           # free reshape
    else:
        # Kernel emitted y0; apply the module's reshape+transpose scramble.
        y = jnp.transpose(jnp.reshape(y2, (map_units, batch, a_pad)), (1, 0, 2))
    if a_pad != num_attrs:
        y = y[..., :num_attrs]
    if not is_batched:
        y = jnp.squeeze(y, axis=0)
    return (y, w_c) if return_constrained_w else y


def _ica_forward_ref(w_assoc, x):
    """Pure-JAX reference reproducing the PyTorch forward bit-for-bit."""
    is_batched = x.ndim == 3
    if not is_batched:
        x = x[None, ...]
    batch, m, a = x.shape
    w = jnp.clip(w_assoc, MIN_VAL, MAX_VAL)
    w = jnp.where(jnp.eye(m, dtype=bool), jnp.asarray(SELF_ASSOC_WEIGHT, w.dtype), w)
    y0 = jnp.einsum("mk,bka->bma", w, x, precision=jax.lax.Precision.HIGHEST)
    y = jnp.transpose(jnp.reshape(y0, (m, batch, a)), (1, 0, 2))
    if not is_batched:
        y = jnp.squeeze(y, axis=0)
    return y, w


if __name__ == "__main__":
    # Small shapes consistent with the module: batch=2, map_units=16 cities,
    # num_attrs=128 attributes.
    batch, map_units, num_attrs = 2, 16, 128
    key = jax.random.PRNGKey(0)
    kw, kx = jax.random.split(key)

    # W deliberately contains out-of-range values and a non-unit diagonal so
    # the in-kernel constrain_() (clip + diagonal override) is exercised.
    w_assoc = jax.random.uniform(
        kw, (map_units, map_units), jnp.float32, minval=-1.5, maxval=1.5)
    x = jax.random.normal(kx, (batch, map_units, num_attrs), dtype=jnp.float32)

    # References first (the kernel aliases the constrained-W output onto W).
    y_exp, w_exp = _ica_forward_ref(w_assoc, x)

    fwd = jax.jit(functools.partial(ica_forward, return_constrained_w=True))
    y, w_c = jax.block_until_ready(fwd(w_assoc, x))

    assert y.shape == (batch, map_units, num_attrs), y.shape
    np.testing.assert_allclose(np.asarray(y), np.asarray(y_exp), rtol=1e-5, atol=1e-5)
    np.testing.assert_allclose(np.asarray(w_c), np.asarray(w_exp), rtol=1e-6, atol=1e-6)

    # Unbatched (2-D input) path.
    y2d = jax.block_until_ready(jax.jit(ica_forward)(w_assoc, x[0]))
    y2d_exp, _ = _ica_forward_ref(w_assoc, x[0])
    assert y2d.shape == (map_units, num_attrs), y2d.shape
    np.testing.assert_allclose(np.asarray(y2d), np.asarray(y2d_exp), rtol=1e-5, atol=1e-5)

    # Batch that does not divide map_units (general path) with a non-multiple-
    # of-128 attribute count (exercises the wrapper lane padding).
    x3 = jax.random.normal(jax.random.PRNGKey(1), (3, map_units, 100), dtype=jnp.float32)
    y3 = jax.block_until_ready(jax.jit(ica_forward)(w_assoc, x3))
    y3_exp, _ = _ica_forward_ref(w_assoc, x3)
    assert y3.shape == (3, map_units, 100), y3.shape
    np.testing.assert_allclose(np.asarray(y3), np.asarray(y3_exp), rtol=1e-5, atol=1e-5)

    print("KERNEL_OK")
</pallas_src>

<mosaic_0001>
module attributes {stable_mosaic.version = 11 : i64} {
  func.func @_ica_kernel(%arg0: memref<16x16xf32, #tpu.memory_space<vmem>>, %arg1: memref<32x128xf32, #tpu.memory_space<vmem>>, %arg2: memref<32x128xf32, #tpu.memory_space<vmem>>, %arg3: memref<16x16xf32, #tpu.memory_space<vmem>>) attributes {dimension_semantics = [], scalar_prefetch = 0 : i64, scratch_operands = 0 : i64, tpu.core_type = #tpu.core_type<tc>} {
    %c0 = arith.constant 0 : index
    %c0_0 = arith.constant 0 : index
    %0 = vector.load %arg0[%c0, %c0_0] : memref<16x16xf32, #tpu.memory_space<vmem>>, vector<16x16xf32>
    %cst = arith.constant -1.000000e+00 : f32
    %cst_1 = arith.constant 1.000000e+00 : f32
    %1 = vector.broadcast %cst : f32 to vector<16x16xf32>
    %2 = arith.maximumf %1, %0 : vector<16x16xf32>
    %3 = vector.broadcast %cst_1 : f32 to vector<16x16xf32>
    %4 = arith.minimumf %3, %2 : vector<16x16xf32>
    %5 = tpu.iota {dimensions = array<i32: 0>} : vector<16x16xi32>
    %6 = tpu.iota {dimensions = array<i32: 1>} : vector<16x16xi32>
    %7 = arith.cmpi eq, %5, %6 : vector<16x16xi32>
    %cst_2 = arith.constant 1.000000e+00 : f32
    %8 = vector.broadcast %cst_2 : f32 to vector<16x16xf32>
    %9 = arith.select %7, %8, %4 : vector<16x16xi1>, vector<16x16xf32>
    %c0_3 = arith.constant 0 : index
    %c0_4 = arith.constant 0 : index
    %10 = vector.load %arg3[%c0_3, %c0_4] : memref<16x16xf32, #tpu.memory_space<vmem>>, vector<16x16xf32>
    tpu.vector_store %arg3[%c0_3, %c0_4], %9 {strides = array<i32>} : memref<16x16xf32, #tpu.memory_space<vmem>>, vector<16x16xf32>,
    %c0_5 = arith.constant 0 : index
    %c0_6 = arith.constant 0 : index
    %11 = vector.load %arg1[%c0_5, %c0_6] : memref<32x128xf32, #tpu.memory_space<vmem>>, vector<32x128xf32>
    %12 = vector.extract_strided_slice %11 {offsets = [0, 0], sizes = [16, 128], strides = [1, 1]} : vector<32x128xf32> to vector<16x128xf32>
    %13 = vector.extract_strided_slice %11 {offsets = [16, 0], sizes = [16, 128], strides = [1, 1]} : vector<32x128xf32> to vector<16x128xf32>
    %14 = tpu.concatenate %12, %13 in 1 : vector<16x128xf32>, vector<16x128xf32> -> vector<16x256xf32>
    %c0_7 = arith.constant 0 : index
    %c0_8 = arith.constant 0 : index
    %15 = tpu.strided_load %arg3[%c0_7, %c0_8] {strides = array<i32: 2, 1>} : memref<16x16xf32, #tpu.memory_space<vmem>>, vector<8x16xf32>
    %c1 = arith.constant 1 : index
    %c0_9 = arith.constant 0 : index
    %16 = tpu.strided_load %arg3[%c1, %c0_9] {strides = array<i32: 2, 1>} : memref<16x16xf32, #tpu.memory_space<vmem>>, vector<8x16xf32>
    %17 = tpu.concatenate %15, %16 in 0 : vector<8x16xf32>, vector<8x16xf32> -> vector<16x16xf32>
    %cst_10 = arith.constant dense<0.000000e+00> : vector<16x256xf32>
    %18 = tpu.matmul %17, %14, %cst_10 {dimension_numbers = #tpu.dot_dimension_numbers<[1], [0], [0], [1], [0, 0, 1, 1], [], []>} : vector<16x16xf32>, vector<16x256xf32>, vector<16x256xf32> -> vector<16x256xf32>
    %19 = vector.extract_strided_slice %18 {offsets = [0, 0], sizes = [8, 128], strides = [1, 1]} : vector<16x256xf32> to vector<8x128xf32>
    %c0_11 = arith.constant 0 : index
    %c0_12 = arith.constant 0 : index
    %20 = vector.load %arg2[%c0_11, %c0_12] : memref<32x128xf32, #tpu.memory_space<vmem>>, vector<8x128xf32>
    tpu.vector_store %arg2[%c0_11, %c0_12], %19 {strides = array<i32>} : memref<32x128xf32, #tpu.memory_space<vmem>>, vector<8x128xf32>,
    %21 = vector.extract_strided_slice %18 {offsets = [0, 128], sizes = [8, 128], strides = [1, 1]} : vector<16x256xf32> to vector<8x128xf32>
    %c8 = arith.constant 8 : index
    %c0_13 = arith.constant 0 : index
    %22 = vector.load %arg2[%c8, %c0_13] : memref<32x128xf32, #tpu.memory_space<vmem>>, vector<8x128xf32>
    tpu.vector_store %arg2[%c8, %c0_13], %21 {strides = array<i32>} : memref<32x128xf32, #tpu.memory_space<vmem>>, vector<8x128xf32>,
    %23 = vector.extract_strided_slice %18 {offsets = [8, 0], sizes = [8, 128], strides = [1, 1]} : vector<16x256xf32> to vector<8x128xf32>
    %c16 = arith.constant 16 : index
    %c0_14 = arith.constant 0 : index
    %24 = vector.load %arg2[%c16, %c0_14] : memref<32x128xf32, #tpu.memory_space<vmem>>, vector<8x128xf32>
    tpu.vector_store %arg2[%c16, %c0_14], %23 {strides = array<i32>} : memref<32x128xf32, #tpu.memory_space<vmem>>, vector<8x128xf32>,
    %25 = vector.extract_strided_slice %18 {offsets = [8, 128], sizes = [8, 128], strides = [1, 1]} : vector<16x256xf32> to vector<8x128xf32>
    %c24 = arith.constant 24 : index
    %c0_15 = arith.constant 0 : index
    %26 = vector.load %arg2[%c24, %c0_15] : memref<32x128xf32, #tpu.memory_space<vmem>>, vector<8x128xf32>
    tpu.vector_store %arg2[%c24, %c0_15], %25 {strides = array<i32>} : memref<32x128xf32, #tpu.memory_space<vmem>>, vector<8x128xf32>,
    return
  }
}

</mosaic_0001>

<bundles_post_ra>
// kernel: ica_forward.1
= control target key start
LH: loop header
LB: loop body
LE: loop exit
PB: predicated region body
PF: predicated region fallthrough
CT: control target
= control target key end

     0   :  { %9 = vsyncpa [#allocation3], 0  ;;  %s261_s0 = inlined_call_operand.vmem [shape: f32[16,16], index: 0, kind: input, shape index: {}, may-alias: {0,3}]   ;;  %s262_s1 = inlined_call_operand.hbm [shape: f32[32,128], index: 1, kind: input, shape index: {}]   ;;  %s263_s2 = inlined_call_operand.hbm [shape: f32[32,128], index: 2, kind: output, shape index: {0}]   ;;  %s264_s3 = inlined_call_operand.vmem [shape: f32[16,16], index: 3, kind: output, shape index: {1}, may-alias: {0,3}]  }
   0x1   :  { %10 = vsyncpa [#allocation4], 0  ;;  %s17_s14 = sshll.u32 %s262_s1, 4  ;;  %s201_s15 = smov [#allocation2]   ;;  %s18_s14 = int_to_ptr.hbm [resolvable:$true] %s17_s14 }
   0x2   :  { %s19_s16 = sshll.u32 %s201_s15, 4  ;;  %s202_s17 = smov 128   ;;  %s20_s16 = int_to_ptr.vmem [resolvable:$true] %s19_s16 }
   0x3   :  { %s203_s18 = smov 8  }
   0x4   :  { %25 = dma.hbm_to_vmem [thread:$0]  %s18_s14, 512, %s20_s16, [#allocation3], %s202_s17, %s202_s17, %s203_s18  }
   0x5   :  { %197 = dma.done.wait [#allocation3], 512  }
   0x6   :  { %198 = vsyncadd [#allocation3], 4294966784  ;;  %v36_v0 = vlaneseq  ;;  %v49_v4 = vld [vmem:[#allocation2 + $0x8] sm:$0xff]  ;;  %v51_v5 = vld [vmem:[#allocation2 + $0x18] sm:$0xff]  ;;  %vm45_vm2 = vcmask 130048   ;;  %s204_s29 = smov [#allocation5]  }
   0x7   :  { %v48_v6 = vld [vmem:[#allocation2] sm:$0xff]  ;;  %141 = vmatpush.msra.mxu2 %v49_v4  ;;  %143 = vmatpush.msra.mxu3 %v51_v5  ;;  %v50_v7 = vld [vmem:[#allocation2 + $0x10] sm:$0xff]  ;;  %v31_v9 = vld [vmem:[%s261_s0 + $0x8] sm:$0xff]  ;;  %s115_s30 = sshll.u32 %s204_s29, 4  ;;  %s117_s6 = sshll.u32 %s263_s2, 4  ;;  %s116_s30 = int_to_ptr.vmem [resolvable:$true] %s115_s30  ;;  %s118_s6 = int_to_ptr.hbm [resolvable:$true] %s117_s6 }
   0x8   :  { %v37_v1 = vshrl.u32 %v36_v0, 7  ;;  %v40_v3 = vand.u32 127, %v36_v0  ;;  %v30_v8 = vld [vmem:[%s261_s0] sm:$0xff]  ;;  %v135_v11 = vclamps-f32 %v31_v9, 1.0  ;;  %75 = vmatpush.msra.mxu0 %v49_v4  ;;  %98 = vmatpush.msra.mxu1 %v51_v5 }
   0x9   :  { %v134_v10 = vclamps-f32 %v30_v8, 1.0  ;;  %142 = vmatpush.msra.mxu2 %v48_v6  ;;  %144 = vmatpush.msra.mxu3 %v50_v7 }
   0xa   :  { %v38_v2 = vadd.s32 8, %v37_v1  ;;  %vm41_vm0 = vcmp.eq.s32.totalorder %v37_v1, %v40_v3  ;;  %76 = vmatpush.msra.mxu0 %v48_v6  ;;  %99 = vmatpush.msra.mxu1 %v50_v7 }
   0xb   :  { %v43_v12 = vsel %vm41_vm0, 1.0, %v134_v10 }
   0xc   :  { %vm42_vm1 = vcmp.eq.s32.totalorder %v38_v2, %v40_v3  ;;  %46 = vst.msk [vmem:[%s264_s3] sm:$0xff] %vm45_vm2, %v43_v12 }
   0xd   :  { %v44_v13 = vsel %vm42_vm1, 1.0, %v135_v11 }
   0xe   :  { %47 = vst.msk [vmem:[%s264_s3 + $0x8] sm:$0xff] %vm45_vm2, %v44_v13 }
  0x15   :  { %v136_v14 = vld [vmem:[%s264_s3 + $0x1] ss:$2 sm:$0xff]  ;;  %v52_v15 = vld [vmem:[%s264_s3] ss:$2 sm:$0xff] }
  0x16   :  { %138 = vmatmul.msk.f32.vlgmr.msra.gmra.mxu2 %vm45_vm2, %v136_v14  ;;  %140 = vmatmul.msk.f32.vlgmr.msra.gmra.mxu3 %vm45_vm2, %v136_v14 }
  0x17   :  { %137 = vmatmul.msk.f32.vlgmr.msra.gmra.mxu0 %vm45_vm2, %v52_v15  ;;  %139 = vmatmul.msk.f32.vlgmr.msra.gmra.mxu1 %vm45_vm2, %v52_v15 }
  0x94   :  { %v78_v16 = vpop.f32.mrf.mxu0  ;;  %v101_v17 = vpop.f32.mrf.mxu1 }
  0x95   :  { %107 = vst [vmem:[#allocation5] sm:$0xff] %v78_v16 }
  0x96   :  { %108 = vst [vmem:[#allocation5 + $0x8] sm:$0xff] %v101_v17 }
  0x99   :  { %v81_v18 = vpop.f32.mrf.mxu2  ;;  %v104_v19 = vpop.f32.mrf.mxu3 }
  0x9a   :  { %109 = vst [vmem:[#allocation5 + $0x10] sm:$0xff] %v81_v18 }
  0x9b   :  { %110 = vst [vmem:[#allocation5 + $0x18] sm:$0xff] %v104_v19 }
  0x9c   :  { %123 = dma.vmem_to_hbm [thread:$0]  %s116_s30, 512, %s118_s6, [#allocation4], %s202_s17, %s202_s17, %s203_s18  }
  0x9d   :  { %199 = dma.done.wait [#allocation4], 512  }
  0x9e   :  { %200 = vsyncadd [#allocation4], 4294966784 }
  0x9f   :  { %132 = vsyncpa [#allocation3], 1 }
  0xa0   :  { %133 = vsyncpa [#allocation4], 1 }

</bundles_post_ra>
